<compile_context>
chip_gen: v7x
topology: tpu7x:2x2x1
jax: 0.10.0
libtpu: 0.0.40
codegen_flags: <defaults>
</compile_context>

<pallas_src>
import functools
import math

import jax
import jax.numpy as jnp
from jax.experimental import pallas as pl
from jax.experimental.pallas import tpu as pltpu


def _round_up(x: int, m: int) -> int:
    return (x + m - 1) // m * m


def _pos_emb_kernel(times_ref, coeff_ref, phase_ref, out_ref):
    # times_ref: (tb, 1)         f32
    # coeff_ref: (1, out_cols)   f32   [0 | 2*pi*w | 2*pi*w]
    # phase_ref: (1, out_cols)   f32   [0 | 0      | pi/2  ]
    # out_ref:   (tb, out_cols)  f32
    t = times_ref[...]                                        # (tb, 1)
    y = jnp.sin(t * coeff_ref[...] + phase_ref[...])          # (tb, out_cols)
    col = jax.lax.broadcasted_iota(jnp.int32, y.shape, 1)
    # Column 0 carries the raw time; everything else is sin/cos.  Single
    # lane-aligned full-width store (no offset-1 partial stores).
    out_ref[...] = jnp.where(col == 0, t, y)


def stable_audio_positional_embedding(times: jax.Array, weights: jax.Array) -> jax.Array:
    """times: arbitrary shape (...,); weights: (half_dim,). Returns (..., 2*half_dim + 1)."""
    half_dim = int(weights.shape[0])
    out_cols = 1 + 2 * half_dim

    orig_shape = times.shape
    b = 1
    for s in orig_shape:
        b *= int(s)

    if b == 0:  # empty input: skip dispatch entirely
        return jnp.zeros((*orig_shape, out_cols), jnp.float32)

    # --- Tile sizing from a VMEM byte budget (lane-padded accounting) -------
    lane_cols = _round_up(out_cols, 128)                  # VMEM rows pad to 128 lanes
    OUT_BLOCK_BUDGET = 4 << 20                            # ~4 MiB per output block
    tb_budget = max(8, (OUT_BLOCK_BUDGET // (lane_cols * 4)) // 8 * 8)

    b_rounded = _round_up(b, 8)
    tb = min(tb_budget, b_rounded)
    if b_rounded > 8:
        # Guarantee >= 2 grid steps so the "parallel" axis can shard across
        # both TensorCores on v7x (neutral on single-TC v5e/v6e).
        tb = min(tb, _round_up(b_rounded // 2, 8))
    tb = max(tb, 8)

    b_padded = _round_up(b_rounded, tb)
    grid = (b_padded // tb,)

    # --- Host-side input prep ----------------------------------------------
    times_flat = times.reshape(b).astype(jnp.float32)
    times2d = jnp.pad(times_flat, (0, b_padded - b)).reshape(b_padded, 1)

    w = weights.reshape(half_dim).astype(jnp.float32)
    two_pi_w = (2.0 * math.pi) * w
    coeff = jnp.concatenate(
        [jnp.zeros((1,), jnp.float32), two_pi_w, two_pi_w]
    ).reshape(1, out_cols)
    phase = jnp.concatenate(
        [jnp.zeros((1 + half_dim,), jnp.float32),
         jnp.full((half_dim,), 0.5 * math.pi, jnp.float32)]
    ).reshape(1, out_cols)

    # --- Explicit scoped-VMEM limit derived from the working set ------------
    out_block_bytes = tb * lane_cols * 4
    times_block_bytes = tb * 128 * 4                      # (tb, 1) pads to 128 lanes
    tables_bytes = 2 * (8 * 128 * 4)
    vmem_needed = 2 * (out_block_bytes + times_block_bytes + tables_bytes)
    vmem_limit = int(min(max(2 * vmem_needed, 16 << 20), 40 << 20))

    cost = pl.CostEstimate(
        flops=2 * b_padded * out_cols,
        transcendentals=b_padded * out_cols,
        bytes_accessed=b_padded * 4 + 2 * out_cols * 4 + b_padded * out_cols * 4,
    )

    out = pl.pallas_call(
        _pos_emb_kernel,
        out_shape=jax.ShapeDtypeStruct((b_padded, out_cols), jnp.float32),
        grid=grid,
        in_specs=[
            pl.BlockSpec((tb, 1), lambda i: (i, 0)),            # times tile
            pl.BlockSpec((1, out_cols), lambda i: (0, 0)),      # coeff table (untiled)
            pl.BlockSpec((1, out_cols), lambda i: (0, 0)),      # phase table (untiled)
        ],
        out_specs=pl.BlockSpec((tb, out_cols), lambda i: (i, 0)),
        compiler_params=pltpu.CompilerParams(
            dimension_semantics=("parallel",),
            vmem_limit_bytes=vmem_limit,
        ),
        cost_estimate=cost,
    )(times2d, coeff, phase)

    # Only batch padding is stripped (no-op when b is already a tile multiple);
    # the feature axis is already exactly out_cols wide.
    result = out[:b] if b_padded != b else out
    return result.reshape(*orig_shape, out_cols)


def _reference(times: jax.Array, weights: jax.Array) -> jax.Array:
    t = times[..., None].astype(jnp.float32)
    freqs = t * weights[None].astype(jnp.float32) * 2.0 * math.pi
    fouriered = jnp.concatenate([jnp.sin(freqs), jnp.cos(freqs)], axis=-1)
    return jnp.concatenate([t, fouriered], axis=-1)


if __name__ == "__main__":
    key = jax.random.PRNGKey(0)
    k_w, k_t = jax.random.split(key)

    dim = 32                      # must be even
    half_dim = dim // 2
    batch = 8

    # Deterministic parameter init (mirrors torch.randn(half_dim)).
    weights = jax.random.normal(k_w, (half_dim,), dtype=jnp.float32)
    # Continuous "times" input, e.g. diffusion timesteps in [0, 1).
    times = jax.random.uniform(k_t, (batch,), dtype=jnp.float32)

    out = stable_audio_positional_embedding(times, weights)
    out = jax.block_until_ready(out)

    ref = _reference(times, weights)
    assert out.shape == (batch, dim + 1), out.shape
    assert jnp.allclose(out, ref, atol=2e-5, rtol=1e-5), float(jnp.max(jnp.abs(out - ref)))

    print("KERNEL_OK")
</pallas_src>

<mosaic_0001>
module attributes {stable_mosaic.version = 11 : i64} {
  func.func @_pos_emb_kernel(%arg0: i32, %arg1: memref<8x1xf32, #tpu.memory_space<vmem>>, %arg2: memref<1x33xf32, #tpu.memory_space<vmem>>, %arg3: memref<1x33xf32, #tpu.memory_space<vmem>>, %arg4: memref<8x33xf32, #tpu.memory_space<vmem>>) attributes {dimension_semantics = [#tpu.dimension_semantics<parallel>], iteration_bounds = array<i64: 1>, scalar_prefetch = 0 : i64, scratch_operands = 0 : i64, tpu.core_type = #tpu.core_type<tc>, window_params = [{transform_indices = @transform_0, window_bounds = array<i64: 8, 1>}, {pipeline_mode = #tpu.pipeline_mode<synchronous>, transform_indices = @transform_1, window_bounds = array<i64: 1, 33>}, {pipeline_mode = #tpu.pipeline_mode<synchronous>, transform_indices = @transform_2, window_bounds = array<i64: 1, 33>}, {transform_indices = @transform_3, window_bounds = array<i64: 8, 33>}]} {
    %c0 = arith.constant 0 : index
    %c0_0 = arith.constant 0 : index
    %0 = vector.load %arg1[%c0, %c0_0] : memref<8x1xf32, #tpu.memory_space<vmem>>, vector<8x1xf32>
    %c0_1 = arith.constant 0 : index
    %c0_2 = arith.constant 0 : index
    %1 = vector.load %arg2[%c0_1, %c0_2] : memref<1x33xf32, #tpu.memory_space<vmem>>, vector<1x33xf32>
    %2 = vector.broadcast %0 : vector<8x1xf32> to vector<8x33xf32>
    %3 = vector.broadcast %1 : vector<1x33xf32> to vector<8x33xf32>
    %4 = arith.mulf %2, %3 : vector<8x33xf32>
    %c0_3 = arith.constant 0 : index
    %c0_4 = arith.constant 0 : index
    %5 = vector.load %arg3[%c0_3, %c0_4] : memref<1x33xf32, #tpu.memory_space<vmem>>, vector<1x33xf32>
    %6 = vector.broadcast %5 : vector<1x33xf32> to vector<8x33xf32>
    %7 = arith.addf %4, %6 : vector<8x33xf32>
    %8 = math.sin %7 : vector<8x33xf32>
    %9 = tpu.iota {dimensions = array<i32: 1>} : vector<8x33xi32>
    %c0_i32 = arith.constant 0 : i32
    %10 = vector.broadcast %c0_i32 : i32 to vector<8x33xi32>
    %11 = arith.cmpi eq, %9, %10 : vector<8x33xi32>
    %12 = vector.shape_cast %0 : vector<8x1xf32> to vector<8x1xf32>
    %13 = vector.broadcast %12 : vector<8x1xf32> to vector<8x33xf32>
    %14 = arith.select %11, %13, %8 : vector<8x33xi1>, vector<8x33xf32>
    %c0_5 = arith.constant 0 : index
    %c0_6 = arith.constant 0 : index
    %15 = vector.load %arg4[%c0_5, %c0_6] : memref<8x33xf32, #tpu.memory_space<vmem>>, vector<8x33xf32>
    tpu.vector_store %arg4[%c0_5, %c0_6], %14 {strides = array<i32>} : memref<8x33xf32, #tpu.memory_space<vmem>>, vector<8x33xf32>,
    return
  }
  func.func @transform_0(%arg0: i32) -> (i32, i32) {
    %c0_i32 = arith.constant 0 : i32
    %c0_i32_0 = arith.constant 0 : i32
    return %arg0, %c0_i32 : i32, i32
  }
  func.func @transform_1(%arg0: i32) -> (i32, i32) {
    %c0_i32 = arith.constant 0 : i32
    %c0_i32_0 = arith.constant 0 : i32
    %c0_i32_1 = arith.constant 0 : i32
    return %c0_i32, %c0_i32_0 : i32, i32
  }
  func.func @transform_2(%arg0: i32) -> (i32, i32) {
    %c0_i32 = arith.constant 0 : i32
    %c0_i32_0 = arith.constant 0 : i32
    %c0_i32_1 = arith.constant 0 : i32
    return %c0_i32, %c0_i32_0 : i32, i32
  }
  func.func @transform_3(%arg0: i32) -> (i32, i32) {
    %c0_i32 = arith.constant 0 : i32
    %c0_i32_0 = arith.constant 0 : i32
    return %arg0, %c0_i32 : i32, i32
  }
}

</mosaic_0001>

<bundles_post_ra>
// kernel: tpu_custom_call.1
= control target key start
LH: loop header
LB: loop body
LE: loop exit
PB: predicated region body
PF: predicated region fallthrough
CT: control target
= control target key end

     0   :  { %v208_v1 = vmov 0   ;;  %s282_s0 = inlined_call_operand.vmem [shape: f32[8,1], index: 0, kind: input, shape index: {}]   ;;  %s283_s1 = inlined_call_operand.vmem [shape: f32[1,33], index: 1, kind: input, shape index: {}]   ;;  %s284_s2 = inlined_call_operand.vmem [shape: f32[1,33], index: 2, kind: input, shape index: {}]   ;;  %s285_s3 = inlined_call_operand.hbm [shape: f32[8,33], index: 3, kind: output, shape index: {}]  }
   0x1   :  { %v15_v0 = vld [vmem:[%s282_s0] sm:$0xff]  ;;  %179 = vset.pattern.permute.xlu0 %v208_v1 }
   0x2   :  { %19 = vperm.xlu0 %179, %v15_v0  }
   0x3   :  { %8 = vsyncpa [#allocation3], 0  ;;  %v161_v2 = vld [vmem:[%s283_s1] ss:$0 sm:$0xff]  ;;  %v209_v17 = vmov 683565275  }
   0x4   :  { %v162_v3 = vld [vmem:[%s284_s2] ss:$0 sm:$0xff]  ;;  %v210_v19 = vmov 2475754826   ;;  %v211_v22 = vmov 2131351028  }
   0x5   :  { %v212_v25 = vmov 2102212464   ;;  %v213_v28 = vmov 920167782   ;;  %v214_v31 = vmov 1326507024  }
   0x6   :  { %s215_s0 = smov [#allocation2]   ;;  %vm145_vm14 = vcmask 269312  }
   0x7   :  { %s153_s1 = sshll.u32 %s215_s0, 4  ;;  %s154_s1 = int_to_ptr.vmem [resolvable:$true] %s153_s1 }
   0x8   :  { %s184_s2 = scalar_lea.vmem %s154_s1, 128  ;;  %p189_p1 = scmp.lt.s32.totalorder %s154_s1, %s154_s1 }
   0x9   :  { %p185_p0 = scmp.ne.s32.totalorder %s154_s1, %s184_s2  ;;  %p190_p2 = scmp.lt.s32.totalorder %s184_s2, %s184_s2 }
   0xb   :  { %p191_p3 = por %p190_p2, %p189_p1 }
   0xd   :  { %p192_p4 = pnand %p191_p3, %p185_p0 }
  0x81   :  { %v245_v4 = vpop.permute.xlu0 %19 }
  0x82   :  { %v28_v5 = vmul.f32 %v161_v2, %v245_v4 }
  0x84   :  { %v248_v6 = vadd.f32 %v162_v3, %v28_v5 }
  0x86   :  { %v40_v7 = vand.u32 2139095040, %v248_v6  ;;  %v37_v11 = vand.u32 2147483647, %v248_v6  ;;  %vm39_vm7 = vcmp.lt.s32.totalorder %v248_v6, 0  ;;  %vm129_vm13 = vweird.f32 %v248_v6 }
  0x88   :  { %v41_v8 = vshrl.u32 %v40_v7, 23  ;;  %v44_v14 = vand.u32 8388607, %v37_v11  ;;  %vm38_vm8 = vcmp.le.f32.partialorder %v37_v11, 0.7853982 }
  0x8a   :  { %v163_v9 = vadd.s32 4294967169, %v41_v8  ;;  %v45_v33 = vor.u32 8388608, %v44_v14 }
  0x8c   :  { %v47_v10 = vadd.s32 1, %v163_v9  ;;  %v85_v47 = vshll.u32 %v45_v33, 8 }
  0x8e   :  { %vm48_vm0 = vcmp.gt.s32.totalorder %v47_v10, 0 }
  0x8f   :  { %v49_v12 = vsel %vm48_vm0, %v47_v10, 0 }
  0x90   :  { %v51_v13 = vand.u32 31, %v49_v12  ;;  %v50_v16 = vshrl.u32 %v49_v12, 5 }
  0x92   :  { %v52_v15 = vsub.s32 32, %v51_v13  ;;  %v54_v18 = vshll.u32 %v209_v17, %v51_v13  ;;  %v57_v20 = vshll.u32 %v210_v19, %v51_v13  ;;  %v60_v24 = vshll.u32 %v211_v22, %v51_v13 }
  0x93   :  { %v63_v27 = vshll.u32 %v212_v25, %v51_v13  ;;  %v66_v30 = vshll.u32 %v213_v28, %v51_v13  ;;  %vm69_vm1 = vcmp.lt.s32.totalorder %v50_v16, 1  ;;  %vm72_vm2 = vcmp.lt.s32.totalorder %v50_v16, 4 }
  0x94   :  { %v55_v21 = vshrl.u32 %v210_v19, %v52_v15  ;;  %v58_v23 = vshrl.u32 %v211_v22, %v52_v15  ;;  %v61_v26 = vshrl.u32 %v212_v25, %v52_v15  ;;  %v64_v29 = vshrl.u32 %v213_v28, %v52_v15 }
  0x95   :  { %v67_v32 = vshrl.u32 %v214_v31, %v52_v15  ;;  %v53_v42 = vshrl.u32 %v209_v17, %v52_v15  ;;  %vm71_vm3 = vcmp.lt.s32.totalorder %v50_v16, 3  ;;  %vm70_vm4 = vcmp.lt.s32.totalorder %v50_v16, 2 }
  0x96   :  { %v56_v34 = vor.u32 %v55_v21, %v54_v18  ;;  %v59_v35 = vor.u32 %v58_v23, %v57_v20  ;;  %v62_v36 = vor.u32 %v61_v26, %v60_v24  ;;  %v65_v37 = vor.u32 %v64_v29, %v63_v27 }
  0x97   :  { %v68_v38 = vor.u32 %v67_v32, %v66_v30  ;;  %v141_v28 = vlaneseq }
  0x98   :  { %v74_v39 = vsel %vm72_vm2, %v62_v36, 2102212464  ;;  %v77_v40 = vsel %vm69_vm1, %v56_v34, %v59_v35  ;;  %v81_v41 = vsel %vm69_vm1, %v59_v35, %v62_v36  ;;  %v78_v43 = vsel %vm72_vm2, %v65_v37, 920167782 }
  0x99   :  { %v82_v44 = vsel %vm72_vm2, %v68_v38, 1326507024  ;;  %v79_v45 = vsel %vm71_vm3, %v62_v36, %v78_v43  ;;  %v73_v48 = vsel %vm69_vm1, %v53_v42, %v56_v34  ;;  %v75_v49 = vsel %vm71_vm3, %v59_v35, %v74_v39 }
  0x9a   :  { %v83_v46 = vsel %vm71_vm3, %v65_v37, %v82_v44  ;;  %v80_v50 = vsel %vm70_vm4, %v77_v40, %v79_v45  ;;  %v76_v56 = vsel %vm70_vm4, %v73_v48, %v75_v49  ;;  %v142_v31 = vand.u32 127, %v141_v28 }
  0x9b   :  { %v84_v51 = vsel %vm70_vm4, %v81_v41, %v83_v46  ;;  %v257_v54 = vmul.u32.u64.low %v85_v47, %v80_v50  ;;  %v258_v55 = vmul.u32.u64.high %v85_v47, %v80_v50, %v257_v54  ;;  %v92_v58 = vmul.u32 %v85_v47, %v76_v56 }
  0x9c   :  { %v254_v52 = vmul.u32.u64.low %v85_v47, %v84_v51  ;;  %v255_v53 = vmul.u32.u64.high %v85_v47, %v84_v51, %v254_v52  ;;  %vm143_vm11 = vcmp.eq.s32.totalorder %v142_v31, 0 }
  0x9d   :  { %v95_v57 = vadd.s32 1, %v258_v55 }
  0x9e   :  { %vm94_vm5 = vc.u32 %v255_v53, %v257_v54  ;;  %v93_v8 = vadd.s32 %v257_v54, %v255_v53 }
  0x9f   :  { %v96_v59 = vsel %vm94_vm5, %v95_v57, %v258_v55 }
  0xa0   :  { %v97_v60 = vadd.s32 %v96_v59, %v92_v58 }
  0xa2   :  { %v98_v61 = vadd.s32 536870912, %v97_v60 }
  0xa4   :  { %v99_v62 = vshrl.u32 %v98_v61, 30 }
  0xa6   :  { %v100_v63 = vshll.u32 %v99_v62, 30  ;;  %v123_v21 = vsub.s32 4, %v99_v62 }
  0xa8   :  { %v101_v0 = vsub.s32 %v97_v60, %v100_v63  ;;  %v124_v24 = vsel %vm39_vm7, %v123_v21, %v99_v62 }
  0xa9   :  { %v126_v26 = vsel %vm38_vm8, 0, %v124_v24 }
  0xaa   :  { %v103_v1 = vsub.s32 0, %v101_v0  ;;  %v130_v27 = vadd.s32 3, %v126_v26 }
  0xac   :  { %v164_v2 = vmin.u32 %v103_v1, %v101_v0  ;;  %v131_v29 = vand.u32 3, %v130_v27 }
  0xae   :  { %v105_v3 = vclz %v164_v2  ;;  %vm136_vm9 = vcmp.eq.s32.totalorder %v131_v29, 2  ;;  %vm133_vm10 = vcmp.eq.s32.totalorder %v131_v29, 0  ;;  %vm132_vm12 = vcmp.lt.s32.totalorder %v131_v29, 2 }
  0xb0   :  { %v165_v5 = vadd.s32 4294967294, %v105_v3 }
  0xb2   :  { %vm166_vm6 = vcmp.lt.s32.totalorder %v165_v5, 0 }
  0xb3   :  { %v108_v7 = vsel %vm166_vm6, 0, %v165_v5 }
  0xb4   :  { %v109_v9 = vsub.s32 32, %v108_v7  ;;  %v113_v10 = vsub.s32 4294967266, %v108_v7  ;;  %v110_v12 = vshll.u32 %v101_v0, %v108_v7 }
  0xb6   :  { %v111_v13 = vshrl.u32 %v93_v8, %v109_v9  ;;  %v114_v14 = vadd.s32 127, %v113_v10 }
  0xb8   :  { %v112_v15 = vor.u32 %v111_v13, %v110_v12  ;;  %v115_v16 = vshll.u32 %v114_v14, 23 }
  0xba   :  { %v116_v17 = vor.u32 4788187, %v115_v16  ;;  %v119_v19 = vcvt.s32.f32 %v112_v15 }
  0xbc   :  { %v117_v18 = vand.u32 2147483647, %v116_v17 }
  0xbe   :  { %v120_v20 = vmul.f32 %v119_v19, %v117_v18 }
  0xc0   :  { %v121_v22 = vxor.u32 2147483648, %v120_v20 }
  0xc2   :  { %v122_v23 = vsel %vm39_vm7, %v121_v22, %v120_v20 }
  0xc3   :  { %v125_v25 = vsel %vm38_vm8, %v248_v6, %v122_v23 }
  0xc4   :  { %180 = vcosq.f32 %v125_v25 }
  0xc5   :  { %182 = vsinq.f32 %v125_v25 }
  0xce   :  { %v181_v30 = vpop.eup %180 }
  0xcf   :  { %v183_v32 = vpop.eup %182  ;;  %v137_v33 = vxor.u32 2147483648, %v181_v30 }
  0xd0   :  { %v134_v34 = vxor.u32 2147483648, %v183_v32 }
  0xd1   :  { %v138_v35 = vsel %vm136_vm9, %v137_v33, %v183_v32 }
  0xd2   :  { %v135_v11 = vsel %vm133_vm10, %v181_v30, %v134_v34 }
  0xd3   :  { %v139_v36 = vsel %vm132_vm12, %v135_v11, %v138_v35 }
  0xd4   :  { %v140_v37 = vsel %vm129_vm13, nan, %v139_v36 }
  0xd5   :  { %v144_v38 = vsel %vm143_vm11, %v245_v4, %v140_v37 }
  0xd6   :  { %146 = vst.msk [vmem:[#allocation2] sm:$0xff] %vm145_vm14, %v144_v38 }
  0xd7   :  { %195 = shalt.err (!%p192_p4)
}
  0xd8   :  { %s196_s20 = scalar_lea.hbm %s285_s3, 128 }
  0xd9   :  { %p197_p5 = scmp.ne.s32.totalorder %s285_s3, %s196_s20  ;;  %p200_p6 = scmp.lt.u32.totalorder %s196_s20, %s285_s3 }
  0xdb   :  { %p202_p7 = pnand %p200_p6, %p197_p5 }
  0xdd   :  { %205 = shalt.err (!%p202_p7)
}
  0xde   :  { %156 = dma.vmem_to_hbm [thread:$0]  %s154_s1, 128, %s285_s3, [#allocation3]  }
  0xdf   :  { %206 = dma.done.wait [#allocation3], 128  }
  0xe0   :  { %207 = vsyncadd [#allocation3], 4294967168 }
  0xe1   :  { %160 = vsyncpa [#allocation3], 1 }

</bundles_post_ra>
